<compile_context>
chip_gen: v6e
topology: v6e:2x2x1
jax: 0.10.0
libtpu: 0.0.40
codegen_flags: <defaults>
</compile_context>

<pallas_src>
import functools

import jax
import jax.numpy as jnp
from jax import lax
from jax.experimental import pallas as pl
from jax.experimental.pallas import tpu as pltpu

_LANES = 128
_TILE_ROWS = 4096            # 4096 x 128 x 4 B = 2 MiB per f32 input tile
_VMEM_LIMIT = 32 * 1024 * 1024  # 2 inputs x 2 buffers x 2 MiB = 8 MiB + headroom


def _log1p_mse_kernel(logp_ref, true_ref, out_ref, *, tile_rows, total_rows,
                      need_mask):
    """Accumulate an (8, 128) partial sum of squared log1p errors."""
    i = pl.program_id(0)

    @pl.when(i == 0)
    def _():
        out_ref[...] = jnp.zeros_like(out_ref)

    # Cast exactly once, in-kernel (free VPU op; keeps the wrapper copy-free).
    log_true = jnp.log1p(true_ref[...].astype(jnp.float32))
    diff = log_true - logp_ref[...].astype(jnp.float32)
    sq = diff * diff

    if tile_rows % 8 == 0:
        # Pure-VPU partial reduce: collapse sublane groups onto the (8, 128)
        # accumulator resident in the output block.
        def accumulate(vals):
            out_ref[...] += jnp.sum(vals.reshape(tile_rows // 8, 8, _LANES),
                                    axis=0)
    else:
        # Tiny single-block case (rows not a multiple of 8): reduce rows once.
        def accumulate(vals):
            out_ref[0:1, :] += jnp.sum(vals, axis=0, keepdims=True)

    if need_mask:
        # Only the true last block can extend past `total_rows`; gate the
        # iota+compare+select so aligned steps pay nothing.
        last = pl.num_programs(0) - 1

        @pl.when(i != last)
        def _():
            accumulate(sq)

        @pl.when(i == last)
        def _():
            valid = total_rows - i * tile_rows
            row_idx = lax.broadcasted_iota(jnp.int32, (tile_rows, _LANES), 0)
            # Mask immediately after `sq` so garbage rows (which may hold
            # NaN/Inf after log1p) never reach the accumulator.
            accumulate(jnp.where(row_idx < valid, sq, jnp.float32(0.0)))
    else:
        accumulate(sq)


@jax.jit
def log1p_mse_loss(log_predicted_counts, true_counts):
    assert log_predicted_counts.shape == true_counts.shape
    n_elems = log_predicted_counts.size

    lp = jnp.ravel(log_predicted_counts)
    tc = jnp.ravel(true_counts)

    rows = n_elems // _LANES
    rem = n_elems - rows * _LANES

    # Non-lane-aligned tail (< 128 elements): compute in plain JAX instead of
    # materializing padded copies of both inputs in HBM.
    tail_sum = jnp.float32(0.0)
    if rem:
        lp_tail = lp[rows * _LANES:].astype(jnp.float32)
        tc_tail = tc[rows * _LANES:].astype(jnp.float32)
        d = jnp.log1p(tc_tail) - lp_tail
        tail_sum = jnp.sum(d * d)

    # Exact reciprocal computed in Python double, then one f32 multiply.
    inv_n = jnp.float32(1.0 / n_elems)

    if rows == 0:
        return tail_sum * inv_n

    lp2 = lp[: rows * _LANES].reshape(rows, _LANES)
    tc2 = tc[: rows * _LANES].reshape(rows, _LANES)

    tile_rows = rows if rows <= _TILE_ROWS else _TILE_ROWS
    total_blocks = pl.cdiv(rows, tile_rows)
    need_mask = (total_blocks * tile_rows) != rows

    kernel = functools.partial(
        _log1p_mse_kernel,
        tile_rows=tile_rows,
        total_rows=rows,
        need_mask=need_mask,
    )

    partials = pl.pallas_call(
        kernel,
        out_shape=jax.ShapeDtypeStruct((8, _LANES), jnp.float32),
        grid_spec=pltpu.PrefetchScalarGridSpec(
            num_scalar_prefetch=0,
            grid=(total_blocks,),
            in_specs=[
                pl.BlockSpec((tile_rows, _LANES), lambda i: (i, 0)),
                pl.BlockSpec((tile_rows, _LANES), lambda i: (i, 0)),
            ],
            out_specs=pl.BlockSpec((8, _LANES), lambda i: (0, 0)),
        ),
        compiler_params=pltpu.CompilerParams(
            dimension_semantics=("arbitrary",),
            vmem_limit_bytes=_VMEM_LIMIT,
        ),
        cost_estimate=pl.CostEstimate(
            flops=3 * n_elems,
            transcendentals=n_elems,
            bytes_accessed=8 * n_elems,
        ),
    )(lp2, tc2)

    # Single final cross-lane reduction over the tiny partial slab, then mean
    # over the *original* number of elements.
    return (jnp.sum(partials) + tail_sum) * inv_n


def _reference(log_predicted_counts, true_counts):
    return jnp.mean(
        jnp.square(jnp.log1p(true_counts.astype(jnp.float32))
                   - log_predicted_counts.astype(jnp.float32)))


if __name__ == "__main__":
    key = jax.random.PRNGKey(0)

    ok = True

    # Primary test: small NCHW-like shape consistent with the module's
    # "any shape" contract.
    k1, k2, key = jax.random.split(key, 3)[0], jax.random.split(key, 3)[1], key
    shape = (2, 4, 16, 16)
    k1, k2 = jax.random.split(jax.random.PRNGKey(0))
    log_predicted_counts = jax.random.normal(k1, shape, dtype=jnp.float32)
    true_counts = jax.random.randint(k2, shape, 0, 10).astype(jnp.float32)

    loss = log1p_mse_loss(log_predicted_counts, true_counts)
    jax.block_until_ready(loss)
    ref = _reference(log_predicted_counts, true_counts)
    ok &= bool(jnp.allclose(loss, ref, rtol=1e-5, atol=1e-5))

    # Ragged test: non-lane-aligned total and rows not a multiple of 8.
    k3, k4 = jax.random.split(jax.random.PRNGKey(1))
    shape2 = (37, 131)
    lp2 = jax.random.normal(k3, shape2, dtype=jnp.float32)
    tc2 = jax.random.randint(k4, shape2, 0, 10).astype(jnp.float32)
    loss2 = log1p_mse_loss(lp2, tc2)
    jax.block_until_ready(loss2)
    ok &= bool(jnp.allclose(loss2, _reference(lp2, tc2), rtol=1e-5, atol=1e-5))

    # Multi-block test with a masked last block (rows > tile_rows, uneven).
    k5, k6 = jax.random.split(jax.random.PRNGKey(2))
    shape3 = (4100, 128)
    lp3 = jax.random.normal(k5, shape3, dtype=jnp.float32)
    tc3 = jax.random.randint(k6, shape3, 0, 10).astype(jnp.float32)
    loss3 = log1p_mse_loss(lp3, tc3)
    jax.block_until_ready(loss3)
    ok &= bool(jnp.allclose(loss3, _reference(lp3, tc3), rtol=1e-5, atol=1e-5))

    assert ok, (loss, ref, loss2, loss3)
    print("KERNEL_OK")
</pallas_src>

<mosaic_0001>
module attributes {stable_mosaic.version = 11 : i64} {
  func.func @_log1p_mse_kernel(%arg0: i32, %arg1: memref<16x128xf32, #tpu.memory_space<vmem>>, %arg2: memref<16x128xf32, #tpu.memory_space<vmem>>, %arg3: memref<8x128xf32, #tpu.memory_space<vmem>>) attributes {dimension_semantics = [#tpu.dimension_semantics<arbitrary>], iteration_bounds = array<i64: 1>, scalar_prefetch = 0 : i64, scratch_operands = 0 : i64, tpu.core_type = #tpu.core_type<tc>, window_params = [{transform_indices = @transform_0, window_bounds = array<i64: 16, 128>}, {transform_indices = @transform_1, window_bounds = array<i64: 16, 128>}, {pipeline_mode = #tpu.pipeline_mode<synchronous>, transform_indices = @transform_2, window_bounds = array<i64: 8, 128>}]} {
    %c0_i32 = arith.constant 0 : i32
    %0 = arith.cmpi eq, %arg0, %c0_i32 : i32
    %1 = arith.extui %0 : i1 to i32
    %c0_i32_0 = arith.constant 0 : i32
    %2 = arith.cmpi ne, %1, %c0_i32_0 : i32
    scf.if %2 {
      %cst_8 = arith.constant 0.000000e+00 : f32
      %13 = vector.broadcast %cst_8 : f32 to vector<8x128xf32>
      %c0_9 = arith.constant 0 : index
      %c0_10 = arith.constant 0 : index
      %14 = vector.load %arg3[%c0_9, %c0_10] : memref<8x128xf32, #tpu.memory_space<vmem>>, vector<8x128xf32>
      tpu.vector_store %arg3[%c0_9, %c0_10], %13 {strides = array<i32>} : memref<8x128xf32, #tpu.memory_space<vmem>>, vector<8x128xf32>,
    } else {
    }
    %c0 = arith.constant 0 : index
    %c0_1 = arith.constant 0 : index
    %3 = vector.load %arg2[%c0, %c0_1] : memref<16x128xf32, #tpu.memory_space<vmem>>, vector<16x128xf32>
    %4 = math.log1p %3 : vector<16x128xf32>
    %c0_2 = arith.constant 0 : index
    %c0_3 = arith.constant 0 : index
    %5 = vector.load %arg1[%c0_2, %c0_3] : memref<16x128xf32, #tpu.memory_space<vmem>>, vector<16x128xf32>
    %6 = arith.subf %4, %5 : vector<16x128xf32>
    %7 = arith.mulf %6, %6 : vector<16x128xf32>
    %c0_4 = arith.constant 0 : index
    %c0_5 = arith.constant 0 : index
    %8 = vector.load %arg3[%c0_4, %c0_5] : memref<8x128xf32, #tpu.memory_space<vmem>>, vector<8x128xf32>
    %9 = vector.shape_cast %7 : vector<16x128xf32> to vector<2x8x128xf32>
    %cst = arith.constant dense<0.000000e+00> : vector<8x128xf32>
    %10 = vector.multi_reduction <add>, %9, %cst [0] : vector<2x8x128xf32> to vector<8x128xf32>
    %11 = arith.addf %8, %10 : vector<8x128xf32>
    %c0_6 = arith.constant 0 : index
    %c0_7 = arith.constant 0 : index
    %12 = vector.load %arg3[%c0_6, %c0_7] : memref<8x128xf32, #tpu.memory_space<vmem>>, vector<8x128xf32>
    tpu.vector_store %arg3[%c0_6, %c0_7], %11 {strides = array<i32>} : memref<8x128xf32, #tpu.memory_space<vmem>>, vector<8x128xf32>,
    return
  }
  func.func @transform_0(%arg0: i32) -> (i32, i32) {
    %c0_i32 = arith.constant 0 : i32
    %c0_i32_0 = arith.constant 0 : i32
    return %arg0, %c0_i32 : i32, i32
  }
  func.func @transform_1(%arg0: i32) -> (i32, i32) {
    %c0_i32 = arith.constant 0 : i32
    %c0_i32_0 = arith.constant 0 : i32
    return %arg0, %c0_i32 : i32, i32
  }
  func.func @transform_2(%arg0: i32) -> (i32, i32) {
    %c0_i32 = arith.constant 0 : i32
    %c0_i32_0 = arith.constant 0 : i32
    %c0_i32_1 = arith.constant 0 : i32
    return %c0_i32, %c0_i32_0 : i32, i32
  }
}

</mosaic_0001>

<bundles_post_ra>
// kernel: log1p_mse_loss.1
= control target key start
LH: loop header
LB: loop body
LE: loop exit
PB: predicated region body
PF: predicated region fallthrough
CT: control target
= control target key end

     0   :  { %s85_s1 = inlined_call_operand.vmem [shape: f32[16,128], index: 1, kind: input, shape index: {}]   ;;  %s86_s0 = inlined_call_operand.vmem [shape: f32[16,128], index: 0, kind: input, shape index: {}]   ;;  %s87_s2 = inlined_call_operand.vmem [shape: f32[8,128], index: 2, kind: output, shape index: {}]  }
   0x1   :  { %v16_v0 = vld [vmem:[%s85_s1] sm:$0xff]  ;;  %v17_v1 = vld [vmem:[%s85_s1 + $0x8] sm:$0xff] }
   0x2   :  { %v18_v2 = vadd.f32 1.0, %v16_v0  ;;  %v27_v3 = vadd.f32 1.0, %v17_v1  ;;  %v21_v4 = vmul.f32 -0.5, %v16_v0  ;;  %v30_v5 = vmul.f32 -0.5, %v17_v1  ;;  %v36_v15 = vld [vmem:[%s86_s0] sm:$0xff]  ;;  %v37_v17 = vld [vmem:[%s86_s0 + $0x8] sm:$0xff] }
   0x3   :  { %v24_v7 = vand.u32 2147483647, %v16_v0  ;;  %v33_v9 = vand.u32 2147483647, %v17_v1 }
   0x4   :  { %51 = vlog2.f32 %v18_v2  ;;  %v22_v6 = vadd.f32 1.0, %v21_v4  ;;  %v31_v8 = vadd.f32 1.0, %v30_v5 }
   0x5   :  { %53 = vlog2.f32 %v27_v3  ;;  %vm25_vm0 = vcmp.lt.f32.partialorder %v24_v7, 0.0004427343  ;;  %vm34_vm1 = vcmp.lt.f32.partialorder %v33_v9, 0.0004427343 }
   0x6   :  { %v23_v10 = vmul.f32 %v22_v6, %v16_v0  ;;  %v32_v12 = vmul.f32 %v31_v8, %v17_v1 }
  0x11   :  { %v52_v11 = vpop.eup %51 }
  0x12   :  { %v54_v13 = vpop.eup %53  ;;  %v20_v14 = vmul.f32 0.6931472, %v52_v11 }
  0x13   :  { %v29_v16 = vmul.f32 0.6931472, %v54_v13 }
  0x14   :  { %v26_v18 = vsel %vm25_vm0, %v23_v10, %v20_v14 }
  0x15   :  { %v35_v19 = vsel %vm34_vm1, %v32_v12, %v29_v16  ;;  %v38_v20 = vsub.f32 %v26_v18, %v36_v15 }
  0x16   :  { %v39_v21 = vsub.f32 %v35_v19, %v37_v17 }
  0x17   :  { %v40_v22 = vmul.f32 %v38_v20, %v38_v20 }
  0x18   :  { %v41_v23 = vmul.f32 %v39_v21, %v39_v21 }
  0x1a   :  { %v43_v24 = vadd.f32 %v41_v23, %v40_v22 }
  0x1c   :  { %45 = vst [vmem:[%s87_s2] sm:$0xff] %v43_v24 }

</bundles_post_ra>
